<compile_context>
chip_gen: v7x
topology: tpu7x:2x2x1
jax: 0.10.0
libtpu: 0.0.40
codegen_flags: <defaults>
</compile_context>

<pallas_src>
import functools

import jax
import jax.numpy as jnp
from jax.experimental import pallas as pl
from jax.experimental.pallas import tpu as pltpu


# -----------------------------------------------------------------------------
# Fused kernel (one batch per grid step, everything channels-first):
#   [x -> relu(x + x@alpha + bias)] * num_layers
#   -> LayerNorm(C) -> Linear -> ReLU -> Linear -> residual -> LayerNorm(C)
# -----------------------------------------------------------------------------
def _trans_linear_kernel(x_ref, alpha_ref, nl_bias_ref,
                         g1_ref, b1_ref, w1_ref, c1_ref,
                         w2_ref, c2_ref, g2_ref, b2_ref,
                         o_ref, *, num_layers):
    eps = 1e-5
    _, C, N = x_ref.shape

    # ---- Stage 1: shared NormLinear + residual + ReLU stack ------------------
    alpha = alpha_ref[...]                                    # (N, N) bf16, resident
    bias = jnp.broadcast_to(nl_bias_ref[...], (C, N))         # hoisted out of the loop

    def layer(_, xc):
        # bf16 operands, f32 accumulation on the MXU.
        y = jnp.dot(xc.astype(jnp.bfloat16), alpha,
                    preferred_element_type=jnp.float32) + bias
        return jnp.maximum(xc + y, 0.0)                       # residual + ReLU (f32)

    unroll = num_layers if num_layers <= 4 else 4             # partial unroll cap
    xb = jax.lax.fori_loop(0, num_layers, layer, x_ref[0], unroll=unroll)   # (C, N)

    # ---- Stage 2: FFN block, channels-first, one matmul per Linear -----------
    # norm1 over channels (axis 0 = sublanes)
    mu = jnp.mean(xb, axis=0, keepdims=True)
    var = jnp.mean(jnp.square(xb - mu), axis=0, keepdims=True)
    xn = (xb - mu) * jax.lax.rsqrt(var + eps)
    xn = xn * g1_ref[...] + b1_ref[...]                       # (C, N)

    # lin1 -> relu -> lin2  (PyTorch (out,in) weights => y = W @ x + b, no transposes)
    h = jnp.maximum(
        jnp.dot(w1_ref[...], xn, preferred_element_type=jnp.float32) + c1_ref[...],
        0.0)                                                  # (Dh, N)
    y = jnp.dot(w2_ref[...], h, preferred_element_type=jnp.float32) + c2_ref[...]
    y = y + xn                                                # residual with norm1 output

    # norm2 over channels
    mu2 = jnp.mean(y, axis=0, keepdims=True)
    var2 = jnp.mean(jnp.square(y - mu2), axis=0, keepdims=True)
    yn = (y - mu2) * jax.lax.rsqrt(var2 + eps)
    o_ref[0] = yn * g2_ref[...] + b2_ref[...]                 # one wide (C, N) store


# -----------------------------------------------------------------------------
# Wrapper: grid over batch ("parallel"), params resident via constant index_maps.
# -----------------------------------------------------------------------------
def trans_linear_forward(x, params, num_layers):
    B, C, H, W = x.shape
    N = H * W
    Dh = params["W1"].shape[0]

    # Hoisted, batch/layer-invariant column softmax of the shared trans matrix,
    # cast once to bf16 for the MXU (accumulation stays f32 inside the kernel).
    alpha = jax.nn.softmax(params["trans"], axis=0).astype(jnp.bfloat16)

    x3 = x.reshape(B, C, N)                                   # channels-first

    operands = (
        x3,
        alpha,
        params["nl_bias"].reshape(1, N),
        params["g1"].reshape(C, 1), params["b1"].reshape(C, 1),
        params["W1"], params["c1"].reshape(Dh, 1),
        params["W2"], params["c2"].reshape(C, 1),
        params["g2"].reshape(C, 1), params["b2"].reshape(C, 1),
    )

    # Explicit VMEM budget: resident params (x2 for buffering) + double-buffered
    # x/out tiles + headroom.  Floors at 16 MiB, capped well under v7x's 64 MiB.
    resident = sum(int(a.nbytes) for a in operands[1:])
    streamed = 2 * 2 * (C * N * 4)                            # x + out tiles, 2-deep
    vmem_limit = int(min(48 << 20, max(2 * resident + streamed + (2 << 20), 16 << 20)))

    def _const(b):                                            # resident across grid steps
        return (0, 0)

    grid_spec = pltpu.PrefetchScalarGridSpec(
        num_scalar_prefetch=0,
        grid=(B,),
        in_specs=[
            pl.BlockSpec((1, C, N), lambda b: (b, 0, 0)),     # x: one batch per step
            pl.BlockSpec((N, N), _const),                     # alpha (bf16, resident)
            pl.BlockSpec((1, N), _const),                     # NormLinear bias
            pl.BlockSpec((C, 1), _const),                     # g1
            pl.BlockSpec((C, 1), _const),                     # b1
            pl.BlockSpec((Dh, C), _const),                    # W1 (out, in)
            pl.BlockSpec((Dh, 1), _const),                    # c1
            pl.BlockSpec((C, Dh), _const),                    # W2 (out, in)
            pl.BlockSpec((C, 1), _const),                     # c2
            pl.BlockSpec((C, 1), _const),                     # g2
            pl.BlockSpec((C, 1), _const),                     # b2
        ],
        out_specs=pl.BlockSpec((1, C, N), lambda b: (b, 0, 0)),
    )

    out = pl.pallas_call(
        functools.partial(_trans_linear_kernel, num_layers=num_layers),
        out_shape=jax.ShapeDtypeStruct((B, C, N), jnp.float32),
        grid_spec=grid_spec,
        compiler_params=pltpu.CompilerParams(
            dimension_semantics=("parallel",),                # batches are independent
            vmem_limit_bytes=vmem_limit),
    )(*operands)

    return out.reshape(B, C, H, W)


# -----------------------------------------------------------------------------
# Pure-JAX reference (PyTorch semantics, channels-last FFN).
# `stage1_dtype` lets us mirror the kernel's bf16 cast for a tight check.
# -----------------------------------------------------------------------------
def reference_forward(x, params, num_layers, stage1_dtype=jnp.float32):
    eps = 1e-5
    B, C, H, W = x.shape
    N = H * W
    x = x.reshape(B, C, N)
    alpha = jax.nn.softmax(params["trans"], axis=0).astype(stage1_dtype)
    for _ in range(num_layers):
        y = jnp.einsum("bcn,nm->bcm", x.astype(stage1_dtype), alpha,
                       preferred_element_type=jnp.float32) + params["nl_bias"]
        x = jnp.maximum(x + y, 0.0)
    x = jnp.transpose(x, (0, 2, 1))                           # (B, N, C)

    mu = x.mean(-1, keepdims=True)
    var = ((x - mu) ** 2).mean(-1, keepdims=True)
    xn = (x - mu) / jnp.sqrt(var + eps) * params["g1"] + params["b1"]

    h = jnp.maximum(xn @ params["W1"].T + params["c1"], 0.0)
    y = h @ params["W2"].T + params["c2"] + xn

    mu2 = y.mean(-1, keepdims=True)
    var2 = ((y - mu2) ** 2).mean(-1, keepdims=True)
    yn = (y - mu2) / jnp.sqrt(var2 + eps) * params["g2"] + params["b2"]
    return jnp.transpose(yn, (0, 2, 1)).reshape(B, C, H, W)


if __name__ == "__main__":
    # Small shapes consistent with the module.
    B = 2
    dim_model = 8        # channel dim C
    dim_hid = 32
    height, width = 4, 4
    num_layers = 2
    N = height * width   # size = height * width

    key = jax.random.PRNGKey(0)
    k_x, k_t, k_b, k_w1, k_c1, k_w2, k_c2 = jax.random.split(key, 7)

    x = jax.random.normal(k_x, (B, dim_model, height, width), dtype=jnp.float32)

    params = {
        # NormLinear (shared across deepcopied layers)
        "trans": jax.random.normal(k_t, (N, N), dtype=jnp.float32),
        "nl_bias": jax.random.normal(k_b, (N,), dtype=jnp.float32),
        # LayerNorm1 / LayerNorm2 (PyTorch default init: ones / zeros)
        "g1": jnp.ones((dim_model,), jnp.float32),
        "b1": jnp.zeros((dim_model,), jnp.float32),
        "g2": jnp.ones((dim_model,), jnp.float32),
        "b2": jnp.zeros((dim_model,), jnp.float32),
        # lin1 / lin2 in PyTorch (out_features, in_features) layout
        "W1": jax.random.normal(k_w1, (dim_hid, dim_model), jnp.float32) * 0.1,
        "c1": jax.random.normal(k_c1, (dim_hid,), jnp.float32) * 0.1,
        "W2": jax.random.normal(k_w2, (dim_model, dim_hid), jnp.float32) * 0.1,
        "c2": jax.random.normal(k_c2, (dim_model,), jnp.float32) * 0.1,
    }

    fwd = jax.jit(functools.partial(trans_linear_forward, num_layers=num_layers))
    out = jax.block_until_ready(fwd(x, params))
    assert out.shape == (B, dim_model, height, width)

    # Tight check: reference with the SAME bf16 quantization of the stage-1
    # operands (both sides accumulate in f32) -> verifies the kernel math.
    ref_bf16 = reference_forward(x, params, num_layers, stage1_dtype=jnp.bfloat16)
    assert jnp.allclose(out, ref_bf16, rtol=1e-3, atol=1e-3), "mismatch vs bf16 reference"

    # Loose check: pure-f32 PyTorch-semantics reference; only bounds the
    # bf16 quantization drift introduced by the stage-1 MXU cast.
    ref_f32 = reference_forward(x, params, num_layers, stage1_dtype=jnp.float32)
    assert jnp.allclose(out, ref_f32, rtol=1e-1, atol=1e-1), "bf16 drift too large"

    print("KERNEL_OK")
</pallas_src>

<mosaic_0001>
module attributes {stable_mosaic.version = 11 : i64} {
  func.func @_trans_linear_kernel(%arg0: i32, %arg1: memref<1x8x16xf32, #tpu.memory_space<vmem>>, %arg2: memref<16x16xbf16, #tpu.memory_space<vmem>>, %arg3: memref<1x16xf32, #tpu.memory_space<vmem>>, %arg4: memref<8x1xf32, #tpu.memory_space<vmem>>, %arg5: memref<8x1xf32, #tpu.memory_space<vmem>>, %arg6: memref<32x8xf32, #tpu.memory_space<vmem>>, %arg7: memref<32x1xf32, #tpu.memory_space<vmem>>, %arg8: memref<8x32xf32, #tpu.memory_space<vmem>>, %arg9: memref<8x1xf32, #tpu.memory_space<vmem>>, %arg10: memref<8x1xf32, #tpu.memory_space<vmem>>, %arg11: memref<8x1xf32, #tpu.memory_space<vmem>>, %arg12: memref<1x8x16xf32, #tpu.memory_space<vmem>>) attributes {dimension_semantics = [#tpu.dimension_semantics<parallel>], iteration_bounds = array<i64: 2>, scalar_prefetch = 0 : i64, scratch_operands = 0 : i64, tpu.core_type = #tpu.core_type<tc>, window_params = [{transform_indices = @transform_0, window_bounds = array<i64: 1, 8, 16>}, {pipeline_mode = #tpu.pipeline_mode<synchronous>, transform_indices = @transform_1, window_bounds = array<i64: 16, 16>}, {pipeline_mode = #tpu.pipeline_mode<synchronous>, transform_indices = @transform_2, window_bounds = array<i64: 1, 16>}, {pipeline_mode = #tpu.pipeline_mode<synchronous>, transform_indices = @transform_3, window_bounds = array<i64: 8, 1>}, {pipeline_mode = #tpu.pipeline_mode<synchronous>, transform_indices = @transform_4, window_bounds = array<i64: 8, 1>}, {pipeline_mode = #tpu.pipeline_mode<synchronous>, transform_indices = @transform_5, window_bounds = array<i64: 32, 8>}, {pipeline_mode = #tpu.pipeline_mode<synchronous>, transform_indices = @transform_6, window_bounds = array<i64: 32, 1>}, {pipeline_mode = #tpu.pipeline_mode<synchronous>, transform_indices = @transform_7, window_bounds = array<i64: 8, 32>}, {pipeline_mode = #tpu.pipeline_mode<synchronous>, transform_indices = @transform_8, window_bounds = array<i64: 8, 1>}, {pipeline_mode = #tpu.pipeline_mode<synchronous>, transform_indices = @transform_9, window_bounds = array<i64: 8, 1>}, {pipeline_mode = #tpu.pipeline_mode<synchronous>, transform_indices = @transform_10, window_bounds = array<i64: 8, 1>}, {transform_indices = @transform_11, window_bounds = array<i64: 1, 8, 16>}]} {
    %c0 = arith.constant 0 : index
    %c0_0 = arith.constant 0 : index
    %0 = vector.load %arg2[%c0, %c0_0] : memref<16x16xbf16, #tpu.memory_space<vmem>>, vector<16x16xbf16>
    %c0_1 = arith.constant 0 : index
    %c0_2 = arith.constant 0 : index
    %1 = vector.load %arg3[%c0_1, %c0_2] : memref<1x16xf32, #tpu.memory_space<vmem>>, vector<1x16xf32>
    %2 = vector.shape_cast %1 : vector<1x16xf32> to vector<1x16xf32>
    %3 = vector.broadcast %2 : vector<1x16xf32> to vector<8x16xf32>
    %c0_3 = arith.constant 0 : index
    %c0_4 = arith.constant 0 : index
    %c0_5 = arith.constant 0 : index
    %4 = vector.load %arg1[%c0_3, %c0_4, %c0_5] : memref<1x8x16xf32, #tpu.memory_space<vmem>>, vector<1x8x16xf32>
    %5 = vector.shape_cast %4 : vector<1x8x16xf32> to vector<8x16xf32>
    %c0_i32 = arith.constant 0 : i32
    %6 = arith.truncf %5 : vector<8x16xf32> to vector<8x16xbf16>
    %cst = arith.constant dense<0.000000e+00> : vector<8x16xf32>
    %7 = tpu.matmul %6, %0, %cst {dimension_numbers = #tpu.dot_dimension_numbers<[1], [0], [0], [1], [0, 0, 1, 1], [], []>} : vector<8x16xbf16>, vector<16x16xbf16>, vector<8x16xf32> -> vector<8x16xf32>
    %8 = arith.addf %7, %3 : vector<8x16xf32>
    %9 = arith.addf %5, %8 : vector<8x16xf32>
    %cst_6 = arith.constant 0.000000e+00 : f32
    %10 = vector.broadcast %cst_6 : f32 to vector<8x16xf32>
    %11 = arith.maximumf %9, %10 : vector<8x16xf32>
    %c1_i32 = arith.constant 1 : i32
    %12 = arith.truncf %11 : vector<8x16xf32> to vector<8x16xbf16>
    %cst_7 = arith.constant dense<0.000000e+00> : vector<8x16xf32>
    %13 = tpu.matmul %12, %0, %cst_7 {dimension_numbers = #tpu.dot_dimension_numbers<[1], [0], [0], [1], [0, 0, 1, 1], [], []>} : vector<8x16xbf16>, vector<16x16xbf16>, vector<8x16xf32> -> vector<8x16xf32>
    %14 = arith.addf %13, %3 : vector<8x16xf32>
    %15 = arith.addf %11, %14 : vector<8x16xf32>
    %cst_8 = arith.constant 0.000000e+00 : f32
    %16 = vector.broadcast %cst_8 : f32 to vector<8x16xf32>
    %17 = arith.maximumf %15, %16 : vector<8x16xf32>
    %cst_9 = arith.constant dense<0.000000e+00> : vector<16xf32>
    %18 = vector.multi_reduction <add>, %17, %cst_9 [0] : vector<8x16xf32> to vector<16xf32>
    %19 = vector.shape_cast %18 : vector<16xf32> to vector<1x16xf32>
    %cst_10 = arith.constant 8.000000e+00 : f32
    %20 = vector.broadcast %cst_10 : f32 to vector<1x16xf32>
    %21 = arith.divf %19, %20 : vector<1x16xf32>
    %22 = vector.broadcast %21 : vector<1x16xf32> to vector<8x16xf32>
    %23 = arith.subf %17, %22 : vector<8x16xf32>
    %24 = arith.mulf %23, %23 : vector<8x16xf32>
    %cst_11 = arith.constant dense<0.000000e+00> : vector<16xf32>
    %25 = vector.multi_reduction <add>, %24, %cst_11 [0] : vector<8x16xf32> to vector<16xf32>
    %26 = vector.shape_cast %25 : vector<16xf32> to vector<1x16xf32>
    %cst_12 = arith.constant 8.000000e+00 : f32
    %27 = vector.broadcast %cst_12 : f32 to vector<1x16xf32>
    %28 = arith.divf %26, %27 : vector<1x16xf32>
    %29 = vector.broadcast %21 : vector<1x16xf32> to vector<8x16xf32>
    %30 = arith.subf %17, %29 : vector<8x16xf32>
    %cst_13 = arith.constant 9.99999974E-6 : f32
    %31 = vector.broadcast %cst_13 : f32 to vector<1x16xf32>
    %32 = arith.addf %28, %31 : vector<1x16xf32>
    %33 = math.rsqrt %32 : vector<1x16xf32>
    %34 = vector.broadcast %33 : vector<1x16xf32> to vector<8x16xf32>
    %35 = arith.mulf %30, %34 : vector<8x16xf32>
    %c0_14 = arith.constant 0 : index
    %c0_15 = arith.constant 0 : index
    %36 = vector.load %arg4[%c0_14, %c0_15] : memref<8x1xf32, #tpu.memory_space<vmem>>, vector<8x1xf32>
    %37 = vector.broadcast %36 : vector<8x1xf32> to vector<8x16xf32>
    %38 = arith.mulf %35, %37 : vector<8x16xf32>
    %c0_16 = arith.constant 0 : index
    %c0_17 = arith.constant 0 : index
    %39 = vector.load %arg5[%c0_16, %c0_17] : memref<8x1xf32, #tpu.memory_space<vmem>>, vector<8x1xf32>
    %40 = vector.broadcast %39 : vector<8x1xf32> to vector<8x16xf32>
    %41 = arith.addf %38, %40 : vector<8x16xf32>
    %c0_18 = arith.constant 0 : index
    %c0_19 = arith.constant 0 : index
    %42 = vector.load %arg6[%c0_18, %c0_19] : memref<32x8xf32, #tpu.memory_space<vmem>>, vector<32x8xf32>
    %cst_20 = arith.constant dense<0.000000e+00> : vector<32x16xf32>
    %43 = tpu.matmul %42, %41, %cst_20 {dimension_numbers = #tpu.dot_dimension_numbers<[1], [0], [0], [1], [0, 0, 1, 1], [], []>} : vector<32x8xf32>, vector<8x16xf32>, vector<32x16xf32> -> vector<32x16xf32>
    %c0_21 = arith.constant 0 : index
    %c0_22 = arith.constant 0 : index
    %44 = vector.load %arg7[%c0_21, %c0_22] : memref<32x1xf32, #tpu.memory_space<vmem>>, vector<32x1xf32>
    %45 = vector.broadcast %44 : vector<32x1xf32> to vector<32x16xf32>
    %46 = arith.addf %43, %45 : vector<32x16xf32>
    %cst_23 = arith.constant 0.000000e+00 : f32
    %47 = vector.broadcast %cst_23 : f32 to vector<32x16xf32>
    %48 = arith.maximumf %46, %47 : vector<32x16xf32>
    %c0_24 = arith.constant 0 : index
    %c0_25 = arith.constant 0 : index
    %49 = vector.load %arg8[%c0_24, %c0_25] : memref<8x32xf32, #tpu.memory_space<vmem>>, vector<8x32xf32>
    %cst_26 = arith.constant dense<0.000000e+00> : vector<8x16xf32>
    %50 = tpu.matmul %49, %48, %cst_26 {dimension_numbers = #tpu.dot_dimension_numbers<[1], [0], [0], [1], [0, 0, 1, 1], [], []>} : vector<8x32xf32>, vector<32x16xf32>, vector<8x16xf32> -> vector<8x16xf32>
    %c0_27 = arith.constant 0 : index
    %c0_28 = arith.constant 0 : index
    %51 = vector.load %arg9[%c0_27, %c0_28] : memref<8x1xf32, #tpu.memory_space<vmem>>, vector<8x1xf32>
    %52 = vector.broadcast %51 : vector<8x1xf32> to vector<8x16xf32>
    %53 = arith.addf %50, %52 : vector<8x16xf32>
    %54 = arith.addf %53, %41 : vector<8x16xf32>
    %cst_29 = arith.constant dense<0.000000e+00> : vector<16xf32>
    %55 = vector.multi_reduction <add>, %54, %cst_29 [0] : vector<8x16xf32> to vector<16xf32>
    %56 = vector.shape_cast %55 : vector<16xf32> to vector<1x16xf32>
    %cst_30 = arith.constant 8.000000e+00 : f32
    %57 = vector.broadcast %cst_30 : f32 to vector<1x16xf32>
    %58 = arith.divf %56, %57 : vector<1x16xf32>
    %59 = vector.broadcast %58 : vector<1x16xf32> to vector<8x16xf32>
    %60 = arith.subf %54, %59 : vector<8x16xf32>
    %61 = arith.mulf %60, %60 : vector<8x16xf32>
    %cst_31 = arith.constant dense<0.000000e+00> : vector<16xf32>
    %62 = vector.multi_reduction <add>, %61, %cst_31 [0] : vector<8x16xf32> to vector<16xf32>
    %63 = vector.shape_cast %62 : vector<16xf32> to vector<1x16xf32>
    %cst_32 = arith.constant 8.000000e+00 : f32
    %64 = vector.broadcast %cst_32 : f32 to vector<1x16xf32>
    %65 = arith.divf %63, %64 : vector<1x16xf32>
    %66 = vector.broadcast %58 : vector<1x16xf32> to vector<8x16xf32>
    %67 = arith.subf %54, %66 : vector<8x16xf32>
    %cst_33 = arith.constant 9.99999974E-6 : f32
    %68 = vector.broadcast %cst_33 : f32 to vector<1x16xf32>
    %69 = arith.addf %65, %68 : vector<1x16xf32>
    %70 = math.rsqrt %69 : vector<1x16xf32>
    %71 = vector.broadcast %70 : vector<1x16xf32> to vector<8x16xf32>
    %72 = arith.mulf %67, %71 : vector<8x16xf32>
    %c0_34 = arith.constant 0 : index
    %c0_35 = arith.constant 0 : index
    %73 = vector.load %arg10[%c0_34, %c0_35] : memref<8x1xf32, #tpu.memory_space<vmem>>, vector<8x1xf32>
    %74 = vector.broadcast %73 : vector<8x1xf32> to vector<8x16xf32>
    %75 = arith.mulf %72, %74 : vector<8x16xf32>
    %c0_36 = arith.constant 0 : index
    %c0_37 = arith.constant 0 : index
    %76 = vector.load %arg11[%c0_36, %c0_37] : memref<8x1xf32, #tpu.memory_space<vmem>>, vector<8x1xf32>
    %77 = vector.broadcast %76 : vector<8x1xf32> to vector<8x16xf32>
    %78 = arith.addf %75, %77 : vector<8x16xf32>
    %c0_38 = arith.constant 0 : index
    %c0_39 = arith.constant 0 : index
    %c0_40 = arith.constant 0 : index
    %79 = vector.load %arg12[%c0_38, %c0_39, %c0_40] : memref<1x8x16xf32, #tpu.memory_space<vmem>>, vector<1x8x16xf32>
    %80 = vector.shape_cast %79 : vector<1x8x16xf32> to vector<8x16xf32>
    %81 = vector.shape_cast %78 : vector<8x16xf32> to vector<1x8x16xf32>
    tpu.vector_store %arg12[%c0_38, %c0_39, %c0_40], %81 {strides = array<i32>} : memref<1x8x16xf32, #tpu.memory_space<vmem>>, vector<1x8x16xf32>,
    return
  }
  func.func @transform_0(%arg0: i32) -> (i32, i32, i32) {
    %c0_i32 = arith.constant 0 : i32
    %c0_i32_0 = arith.constant 0 : i32
    %c0_i32_1 = arith.constant 0 : i32
    return %arg0, %c0_i32, %c0_i32_0 : i32, i32, i32
  }
  func.func @transform_1(%arg0: i32) -> (i32, i32) {
    %c0_i32 = arith.constant 0 : i32
    %c0_i32_0 = arith.constant 0 : i32
    %c0_i32_1 = arith.constant 0 : i32
    return %c0_i32, %c0_i32_0 : i32, i32
  }
  func.func @transform_2(%arg0: i32) -> (i32, i32) {
    %c0_i32 = arith.constant 0 : i32
    %c0_i32_0 = arith.constant 0 : i32
    %c0_i32_1 = arith.constant 0 : i32
    return %c0_i32, %c0_i32_0 : i32, i32
  }
  func.func @transform_3(%arg0: i32) -> (i32, i32) {
    %c0_i32 = arith.constant 0 : i32
    %c0_i32_0 = arith.constant 0 : i32
    %c0_i32_1 = arith.constant 0 : i32
    return %c0_i32, %c0_i32_0 : i32, i32
  }
  func.func @transform_4(%arg0: i32) -> (i32, i32) {
    %c0_i32 = arith.constant 0 : i32
    %c0_i32_0 = arith.constant 0 : i32
    %c0_i32_1 = arith.constant 0 : i32
    return %c0_i32, %c0_i32_0 : i32, i32
  }
  func.func @transform_5(%arg0: i32) -> (i32, i32) {
    %c0_i32 = arith.constant 0 : i32
    %c0_i32_0 = arith.constant 0 : i32
    %c0_i32_1 = arith.constant 0 : i32
    return %c0_i32, %c0_i32_0 : i32, i32
  }
  func.func @transform_6(%arg0: i32) -> (i32, i32) {
    %c0_i32 = arith.constant 0 : i32
    %c0_i32_0 = arith.constant 0 : i32
    %c0_i32_1 = arith.constant 0 : i32
    return %c0_i32, %c0_i32_0 : i32, i32
  }
  func.func @transform_7(%arg0: i32) -> (i32, i32) {
    %c0_i32 = arith.constant 0 : i32
    %c0_i32_0 = arith.constant 0 : i32
    %c0_i32_1 = arith.constant 0 : i32
    return %c0_i32, %c0_i32_0 : i32, i32
  }
  func.func @transform_8(%arg0: i32) -> (i32, i32) {
    %c0_i32 = arith.constant 0 : i32
    %c0_i32_0 = arith.constant 0 : i32
    %c0_i32_1 = arith.constant 0 : i32
    return %c0_i32, %c0_i32_0 : i32, i32
  }
  func.func @transform_9(%arg0: i32) -> (i32, i32) {
    %c0_i32 = arith.constant 0 : i32
    %c0_i32_0 = arith.constant 0 : i32
    %c0_i32_1 = arith.constant 0 : i32
    return %c0_i32, %c0_i32_0 : i32, i32
  }
  func.func @transform_10(%arg0: i32) -> (i32, i32) {
    %c0_i32 = arith.constant 0 : i32
    %c0_i32_0 = arith.constant 0 : i32
    %c0_i32_1 = arith.constant 0 : i32
    return %c0_i32, %c0_i32_0 : i32, i32
  }
  func.func @transform_11(%arg0: i32) -> (i32, i32, i32) {
    %c0_i32 = arith.constant 0 : i32
    %c0_i32_0 = arith.constant 0 : i32
    %c0_i32_1 = arith.constant 0 : i32
    return %arg0, %c0_i32, %c0_i32_0 : i32, i32, i32
  }
}

</mosaic_0001>

<bundles_post_ra>
// kernel: trans_linear_forward.1
= control target key start
LH: loop header
LB: loop body
LE: loop exit
PB: predicated region body
PF: predicated region fallthrough
CT: control target
= control target key end

     0   :  { %s989_s17 = smov 0   ;;  %s1075_s0 = inlined_call_operand.vmem [shape: f32[2,8,16], index: 0, kind: input, shape index: {}]   ;;  %s1076_s1 = inlined_call_operand.vmem [shape: bf16[16,16], index: 1, kind: input, shape index: {}]   ;;  %s1077_s2 = inlined_call_operand.vmem [shape: f32[1,16], index: 2, kind: input, shape index: {}]   ;;  %s1078_s3 = inlined_call_operand.vmem [shape: f32[8,1], index: 3, kind: input, shape index: {}]   ;;  %s1079_s4 = inlined_call_operand.vmem [shape: f32[8,1], index: 4, kind: input, shape index: {}]   ;;  %s1080_s5 = inlined_call_operand.vmem [shape: f32[32,8], index: 5, kind: input, shape index: {}]   ;;  %s1081_s6 = inlined_call_operand.vmem [shape: f32[32,1], index: 6, kind: input, shape index: {}]   ;;  %s1082_s7 = inlined_call_operand.vmem [shape: f32[8,32], index: 7, kind: input, shape index: {}]   ;;  %s1083_s8 = inlined_call_operand.vmem [shape: f32[8,1], index: 8, kind: input, shape index: {}]   ;;  %s1084_s9 = inlined_call_operand.vmem [shape: f32[8,1], index: 9, kind: input, shape index: {}]   ;;  %s1085_s10 = inlined_call_operand.vmem [shape: f32[8,1], index: 10, kind: input, shape index: {}]   ;;  %s1086_s11 = inlined_call_operand.vmem [shape: f32[2,8,16], index: 11, kind: output, shape index: {}]  }
   0x1 LB: > { %s829_s18 = sadd.s32 4294967295, %s923_s17   ;;  %p833_p0 = scmp.ge.s32.totalorder %s923_s17, 1  ;;  %s923_s17 = sphi %s989_s17, %s21_s17  }
   0x2   : > { %p336_p1 = scmp.lt.s32.totalorder %s923_s17, 3 }
   0x4   : > { %p337_p2 = pnand %p833_p0, %p336_p1 }
   0x5   : > { %v912_v0 = vld [vmem:[%s1076_s1] sm:$0xff] (!%p337_p2)   ;;  %v925_v1 = vmov (!%p337_p2), 0.0   ;;  %p374_p3 = scmp.lt.s32.totalorder (!%p337_p2), %s829_s18, 1  ;;  %vm926_vm0 = vmmov (!%p337_p2), 0   ;;  %vm400_vm1 = vcmask (!%p337_p2), 130048   ;;  %v927_v5 = vmov (!%p337_p2), 0  }
   0x6   : > { %340 = sbr.rel (%p337_p2) target bundleno = 1008 (0x3f0), region = 64  ;;  %861 = vmatprep.subr.bf16.mxu0 (!%p337_p2), %v925_v1  ;;  %867 = vmatprep.subr.bf16.mxu1 (!%p337_p2), %v925_v1  ;;  %v514_v4 = vld [vmem:[%s1078_s3] sm:$0xff] (!%p337_p2)  ;;  %v534_v7 = vld [vmem:[%s1081_s6 + $0x10] sm:$0xff] (!%p337_p2)  ;;  %vm556_vm2 = vcmask (!%p337_p2), 64512   ;;  %v533_v21 = vld [vmem:[%s1081_s6 + $0x8] sm:$0xff] (!%p337_p2)  ;;  %v928_v59 = vmov (!%p337_p2), 0.0|0.0  }
   0x7   : > { %862 = vmatpush3.bf16.msra.mxu0 (!%p337_p2), %v912_v0  ;;  %863 = vmatprep.mubr.msk.bf16.mxu0 (!%p337_p2), %vm926_vm0, %v925_v1  ;;  %v521_v6 = vld [vmem:[%s1079_s4] sm:$0xff] (!%p337_p2)  ;;  %v535_v22 = vld [vmem:[%s1081_s6 + $0x18] sm:$0xff] (!%p337_p2)  ;;  %v529_v56 = vld [vmem:[%s1080_s5 + $0x8] sm:$0xff] (!%p337_p2)  ;;  %vm665_vm3 = vcmask (!%p337_p2), 261120  }
   0x8   : > { %868 = vmatpush3.bf16.msra.mxu1 (!%p337_p2), %v912_v0  ;;  %869 = vmatprep.mubr.msk.bf16.mxu1 (!%p337_p2), %vm926_vm0, %v925_v1  ;;  %v659_v8 = vld [vmem:[%s1083_s8] sm:$0xff] (!%p337_p2)  ;;  %v530_v57 = vld [vmem:[%s1080_s5 + $0x10] sm:$0xff] (!%p337_p2)  ;;  %v531_v58 = vld [vmem:[%s1080_s5 + $0x18] sm:$0xff] (!%p337_p2) }
   0x9   : > { %910 = vset.pattern.permute.xlu0 (!%p337_p2), %v927_v5  ;;  %911 = vset.pattern.permute.xlu1 (!%p337_p2), %v927_v5  ;;  %v768_v9 = vld [vmem:[%s1085_s10] sm:$0xff] (!%p337_p2) }
   0xa   : > { %517 = vperm.xlu0 (!%p337_p2), %910, %v514_v4   ;;  %v836_v10 = vld [vmem:[%s1077_s2] ss:$0 sm:$0xff] (!%p337_p2)  ;;  %892 = vmatprep.subr.bf16.mxu1 (!%p337_p2), %v928_v59 }
   0xb   : > { %v528_v19 = vld [vmem:[%s1080_s5] sm:$0xff] (!%p337_p2) }
   0xc   : > { %v532_v20 = vld [vmem:[%s1081_s6] sm:$0xff] (!%p337_p2) }
   0xd   : > { %s1088_s18 = smov (!%p374_p3, %s829_s18), 1  ;;  %538 = vperm.xlu1 %911, %v532_v20   ;;  %v761_v23 = vld [vmem:[%s1084_s9] sm:$0xff] }
   0xe   : > { %s834_s21 = sshll.u32 %s1088_s18, 3  ;;  %524 = vperm.xlu0 %910, %v521_v6  }
   0xf   : > { %s377_s24 = scalar_lea.vmem %s1075_s0, %s834_s21  ;;  %s381_s25 = scalar_lea.vmem %s1086_s11, %s834_s21 }
  0x10   : > { %v392_v2 = vld [vmem:[%s377_s24] sm:$0xff] }
  0x11   : > { %v393_v3 = vpack.c.bf16 %v392_v2, %v392_v2  ;;  %543 = vperm.xlu1 %911, %v533_v21  }
  0x12   : > { %548 = vperm.xlu0 %910, %v534_v7  }
  0x13   : > { %864 = vmatmul.mubr.msk.bf16.vlgmr.msra.gmra.mrb[0].mxu0 %vm400_vm1, %v393_v3 }
  0x14   : > { %875 = vmatprep.mubr.msk.f32.mxu0 %vm556_vm2, %v528_v19 }
  0x15   : > { %553 = vperm.xlu1 %911, %v535_v22  }
  0x16   : > { %662 = vperm.xlu0 %910, %v659_v8  }
  0x19   : > { %764 = vperm.xlu1 %911, %v761_v23  }
  0x1a   : > { %771 = vperm.xlu0 %910, %v768_v9  }
  0x89   : > { %v518_v50 = vpop.permute.xlu0 %517 }
  0x8c   : > { %v539_v60 = vpop.permute.xlu1 %538 }
  0x8d   : > { %v525_v54 = vpop.permute.xlu0 %524 }
  0x90   : > { %v544_v61 = vpop.permute.xlu1 %543 }
  0x91   : > { %v549_v6 = vpop.permute.xlu0 %548 }
  0x94   : > { %v554_v3 = vpop.permute.xlu1 %553 }
  0xe6   : > { %v438_v11 = vpop.f32.mrb[0].mxu0 }
  0xe7   : > { %v439_v12 = vadd.f32 %v836_v10, %v438_v11  ;;  %v865_v13 = vpop.f32.mrb[1].mxu0 }
  0xe8   : > { %v441_v14 = vpop.f32.mrb[2].mxu0 }
  0xe9   : > { %v444_v15 = vadd.f32 %v439_v12, %v392_v2  ;;  %v866_v16 = vpop.f32.mrb[3].mxu0  ;;  %v658_v14 = vld [vmem:[%s1082_s7] sm:$0xff] }
  0xeb   : > { %v445_v17 = vmax.f32 %v444_v15, 0.0  ;;  %v663_v15 = vpop.permute.xlu0 %662 }
  0xed   : > { %v446_v18 = vpack.c.bf16 %v445_v17, %v445_v17 }
  0xef   : > { %870 = vmatmul.mubr.msk.bf16.vlgmr.msra.gmra.mrb[0].mxu1 %vm400_vm1, %v446_v18 }
  0xf0   : > { %889 = vmatprep.mubr.msk.f32.mxu1 %vm926_vm0, %v925_v1 }
 0x1c2   : > { %v484_v24 = vpop.f32.mrb[0].mxu1 }
 0x1c3   : > { %v485_v25 = vadd.f32 %v836_v10, %v484_v24  ;;  %v871_v26 = vpop.f32.mrb[1].mxu1 }
 0x1c4   : > { %v487_v27 = vpop.f32.mrb[2].mxu1 }
 0x1c5   : > { %v490_v28 = vadd.f32 %v485_v25, %v445_v17  ;;  %v872_v29 = vpop.f32.mrb[3].mxu1 }
 0x1c7   : > { %v491_v30 = vmax.f32 %v490_v28, 0.0 }
 0x1c9   : > { %v492_v31 = vsel %vm400_vm1, %v491_v30, 0.0 }
 0x1ca   : > { %v493_v32 = vrot.slane %v492_v31, 4 }
 0x1cc   : > { %v494_v33 = vadd.f32 %v493_v32, %v492_v31 }
 0x1ce   : > { %v495_v34 = vrot.slane %v494_v33, 2 }
 0x1d0   : > { %v496_v35 = vadd.f32 %v495_v34, %v494_v33 }
 0x1d2   : > { %v497_v36 = vrot.slane %v496_v35, 1 }
 0x1d4   : > { %v498_v37 = vadd.f32 %v497_v36, %v496_v35 }
 0x1d6   : > { %v500_v38 = vmul.f32 0.125, %v498_v37 }
 0x1d8   : > { %v501_v39 = vsub.f32 %v491_v30, %v500_v38 }
 0x1da   : > { %v502_v40 = vmul.f32 %v501_v39, %v501_v39 }
 0x1dc   : > { %v503_v41 = vsel %vm400_vm1, %v502_v40, 0.0 }
 0x1dd   : > { %v504_v42 = vrot.slane %v503_v41, 4 }
 0x1df   : > { %v505_v43 = vadd.f32 %v504_v42, %v503_v41  ;;  %v765_v41 = vpop.permute.xlu1 %764 }
 0x1e1   : > { %v506_v44 = vrot.slane %v505_v43, 2 }
 0x1e3   : > { %v507_v45 = vadd.f32 %v506_v44, %v505_v43  ;;  %v772_v43 = vpop.permute.xlu0 %771 }
 0x1e5   : > { %v508_v46 = vrot.slane %v507_v45, 1 }
 0x1e7   : > { %v509_v47 = vadd.f32 %v508_v46, %v507_v45 }
 0x1e9   : > { %v510_v48 = vmul.f32 0.125, %v509_v47 }
 0x1eb   : > { %v511_v49 = vadd.f32 1e-05, %v510_v48 }
 0x1ed   : > { %913 = vrsqrt.f32 %v511_v49 }
 0x1f7   : > { %v914_v51 = vpop.eup %913 }
 0x1f8   : > { %v513_v52 = vmul.f32 %v914_v51, %v501_v39 }
 0x1fa   : > { %v520_v53 = vmul.f32 %v518_v50, %v513_v52 }
 0x1fc   : > { %v527_v55 = vadd.f32 %v525_v54, %v520_v53 }
 0x1fe   : > { %873 = vmatprep.subr.mxu0 %v527_v55 }
 0x1ff   : > { %874 = vmatpush3.msra.mxu0 %v527_v55 }
 0x200   : > { %876 = vmatmul.mubr.msk.f32.vlgmr.msra.gmra.mrb[4].mxu0 %vm556_vm2, %v529_v56 }
 0x201   : > { %878 = vmatprep.mubr.msk.f32.mxu0 %vm556_vm2, %v530_v57 }
 0x204   : > { %879 = vmatmul.mubr.msk.f32.gmra.mrb[6].mxu0 %vm556_vm2, %v531_v58 }
 0x2d3   : > { %v877_v62 = vpop.f32.mrb[4].mxu0 }
 0x2d4   : > { %v641_v63 = vadd.f32 %v877_v62, %v544_v61  ;;  %v635_v0 = vpop.f32.mrb[5].mxu0 }
 0x2d5   : > { %v636_v1 = vadd.f32 %v635_v0, %v539_v60 }
 0x2d6   : > { %v655_v2 = vmax.f32 %v641_v63, 0.0 }
 0x2d7   : > { %v654_v4 = vmax.f32 %v636_v1, 0.0  ;;  %v880_v5 = vpop.f32.mrb[6].mxu0 }
 0x2d8   : > { %v651_v7 = vadd.f32 %v880_v5, %v554_v3  ;;  %v645_v8 = vpop.f32.mrb[7].mxu0 }
 0x2d9   : > { %v893_v9 = vpack.c.bf16 %v655_v2, %v654_v4  ;;  %v646_v10 = vadd.f32 %v645_v8, %v549_v6 }
 0x2da   : > { %v657_v11 = vmax.f32 %v651_v7, 0.0 }
 0x2db   : > { %v656_v12 = vmax.f32 %v646_v10, 0.0  ;;  %894 = vmatpush3.bf16.msra.mxu1 %v893_v9 }
 0x2dc   : > { %895 = vmatprep.subr.bf16.mxu1 %v928_v59 }
 0x2dd   : > { %v896_v13 = vpack.c.bf16 %v657_v11, %v656_v12 }
 0x2df   : > { %897 = vmatpush3.bf16.msra.mxu1 %v896_v13 }
 0x2e2   : > { %890 = vmatmul.mubr.msk.f32.vlgmr.msra.gmra.mrb[4].mxu1 %vm665_vm3, %v658_v14 }
 0x3b5   : > { %v735_v16 = vpop.f32.mrb[4].mxu1 }
 0x3b6   : > { %v736_v17 = vadd.f32 %v735_v16, %v663_v15  ;;  %v891_v18 = vpop.f32.mrb[5].mxu1 }
 0x3b8   : > { %v739_v19 = vadd.f32 %v736_v17, %v527_v55 }
 0x3ba   : > { %v740_v20 = vsel %vm400_vm1, %v739_v19, 0.0 }
 0x3bb   : > { %v741_v21 = vrot.slane %v740_v20, 4 }
 0x3bd   : > { %v742_v22 = vadd.f32 %v741_v21, %v740_v20 }
 0x3bf   : > { %v743_v23 = vrot.slane %v742_v22, 2 }
 0x3c1   : > { %v744_v24 = vadd.f32 %v743_v23, %v742_v22 }
 0x3c3   : > { %v745_v25 = vrot.slane %v744_v24, 1 }
 0x3c5   : > { %v746_v26 = vadd.f32 %v745_v25, %v744_v24 }
 0x3c7   : > { %v747_v27 = vmul.f32 0.125, %v746_v26 }
 0x3c9   : > { %v748_v28 = vsub.f32 %v739_v19, %v747_v27 }
 0x3cb   : > { %v749_v29 = vmul.f32 %v748_v28, %v748_v28 }
 0x3cd   : > { %v750_v30 = vsel %vm400_vm1, %v749_v29, 0.0 }
 0x3ce   : > { %v751_v31 = vrot.slane %v750_v30, 4 }
 0x3d0   : > { %v752_v32 = vadd.f32 %v751_v31, %v750_v30 }
 0x3d2   : > { %v753_v33 = vrot.slane %v752_v32, 2 }
 0x3d4   : > { %v754_v34 = vadd.f32 %v753_v33, %v752_v32 }
 0x3d6   : > { %v755_v35 = vrot.slane %v754_v34, 1 }
 0x3d8   : > { %v756_v36 = vadd.f32 %v755_v35, %v754_v34 }
 0x3da   : > { %v757_v37 = vmul.f32 0.125, %v756_v36 }
 0x3dc   : > { %v758_v38 = vadd.f32 1e-05, %v757_v37 }
 0x3de   : > { %915 = vrsqrt.f32 %v758_v38 }
 0x3e8   : > { %v916_v39 = vpop.eup %915 }
 0x3e9   : > { %v760_v40 = vmul.f32 %v916_v39, %v748_v28 }
 0x3eb   : > { %v767_v42 = vmul.f32 %v765_v41, %v760_v40 }
 0x3ed   : > { %v774_v44 = vadd.f32 %v772_v43, %v767_v42 }
 0x3ef   : > { %775 = vst.msk [vmem:[%s381_s25] sm:$0xff] %vm400_vm1, %v774_v44 }
 0x3f0 PF: > { %s21_s17 = sadd.s32 1, %s923_s17  }
 0x3f1   : > { %p18_p4 = scmp.ge.s32.totalorder %s21_s17, 4  }
 0x3f3   :  { %20 = sbr.rel (!%p18_p4) target bundleno = 1 (0x1), region = 94 }

</bundles_post_ra>
